<compile_context>
chip_gen: v7x
topology: tpu7x:2x2x1
jax: 0.10.0
libtpu: 0.0.40
codegen_flags: <defaults>
</compile_context>

<pallas_src>
import functools
import math

import jax
import jax.numpy as jnp
from jax.experimental import pallas as pl
from jax.experimental.pallas import tpu as pltpu


LN_EPS = 1e-5            # torch.nn.LayerNorm default
_MAX_ROW_TILE = 4096     # token rows per grid step (upper bound)
_SPLIT_ROWS = 1024       # above this, force >=2 grid steps (dual-TC v7x)


# ----------------------------------------------------------------------------
# small helpers
# ----------------------------------------------------------------------------
def _round_up(x, m):
    return (x + m - 1) // m * m


def _sublane(dtype):
    """Sublane multiple for a dtype: 8 for 4-byte, 16 for 2-byte, 32 for 1-byte."""
    return max(8, 32 // jnp.dtype(dtype).itemsize)


@functools.lru_cache(maxsize=1)
def _tpu_caps():
    """(tile budget bytes, vmem_limit cap bytes) derived from chip VMEM size."""
    try:
        capacity = int(pltpu.get_tpu_info().vmem_capacity_bytes)
    except Exception:
        capacity = 64 << 20                      # conservative (v7x per-TC)
    limit_cap = max(32 << 20, capacity - (12 << 20))   # headroom for Mosaic scratch
    budget = min(3 * capacity // 4, limit_cap - (4 << 20))
    return int(budget), int(limit_cap)


def _vmem_limit(est_bytes, limit_cap):
    return int(min(max(est_bytes * 13 // 10 + (4 << 20), 32 << 20), limit_cap))


def _pick_row_tile(n, budget, fixed, per_row, sub):
    """Row-tile for a (N, C) -> (N, Cout) kernel. Full extent or sublane multiple."""
    avail = max(budget - fixed, per_row * sub)
    cap = max(sub, min(avail // per_row, _MAX_ROW_TILE))
    if n > _SPLIT_ROWS:                       # keep both v7x TCs busy
        cap = min(cap, _round_up(pl.cdiv(n, 2), sub))
    if n <= cap:
        return n                              # single full-extent block
    return max(sub, cap // sub * sub)         # cdiv grid masks the ragged tail


def _pick_merge_tile(bh2, w2, budget, fixed, per_tok, m):
    """Leading-dim tile (in even/odd H-row pairs) for the merge path."""
    avail = max(budget - fixed, per_tok * w2 * m)
    cap = max(m, min(avail // (per_tok * w2), max(1, _MAX_ROW_TILE // w2)))
    if bh2 * w2 > _SPLIT_ROWS:
        cap = min(cap, _round_up(pl.cdiv(bh2, 2), m))
    if bh2 <= cap:
        return bh2                            # full extent -> always legal
    return max(m, cap // m * m)               # tbh*w2 is a sublane multiple


@functools.lru_cache(maxsize=1)
def _single_buffer_supported():
    """Probe whether pipeline_mode=pl.Buffered(1) (single-buffer constants) works."""
    if not hasattr(pl, "Buffered"):
        return False
    try:
        def _probe(a_ref, o_ref):
            o_ref[...] = a_ref[...] + 1.0

        spec = pl.BlockSpec((8, 128), lambda i: (0, 0),
                            pipeline_mode=pl.Buffered(1))
        out = pl.pallas_call(
            _probe,
            out_shape=jax.ShapeDtypeStruct((8, 128), jnp.float32),
            grid=(2,),
            in_specs=[spec],
            out_specs=pl.BlockSpec((8, 128), lambda i: (0, 0)),
        )(jnp.zeros((8, 128), jnp.float32))
        return bool(jnp.all(out == 1.0))
    except Exception:
        return False


def _const_spec(shape, single_buf):
    """BlockSpec for an operand whose block never changes across the grid."""
    zeros = (0,) * len(shape)
    index_map = lambda i: zeros
    if single_buf:
        return pl.BlockSpec(shape, index_map, pipeline_mode=pl.Buffered(1))
    return pl.BlockSpec(shape, index_map)


# ----------------------------------------------------------------------------
# kernels
# ----------------------------------------------------------------------------
def _linear_ln_kernel(x_ref, wt_ref, g_ref, b_ref, o_ref):
    """out = LayerNorm(x @ wt) for one row tile (two-pass stats, f32)."""
    y = jnp.dot(x_ref[...], wt_ref[...], preferred_element_type=jnp.float32)
    mean = jnp.mean(y, axis=-1, keepdims=True)
    d = y - mean
    var = jnp.mean(d * d, axis=-1, keepdims=True)
    out = d * jax.lax.rsqrt(var + LN_EPS)
    out = out * g_ref[...] + b_ref[...]
    o_ref[...] = out.astype(o_ref.dtype)


def _merge_linear_ln_kernel(a_ref, b_ref, wa_ref, wb_ref, g_ref, bt_ref, o_ref):
    """Fused patch-merge (w_only == 0) + linear + LayerNorm for one row tile.

    a = concat([x0, x2], -1) (even H rows), b = concat([x1, x3], -1) (odd rows)
    y = a @ Wa + b @ Wb == (xa + xd) @ W.T
    """
    tbh, w2, c2 = a_ref.shape
    rows = tbh * w2
    # Collapse leading dims only; this is free when w2 is a multiple of the
    # sublane count (8 f32 / 16 bf16), else Mosaic inserts a VMEM relayout.
    a = a_ref[...].reshape(rows, c2)
    b = b_ref[...].reshape(rows, c2)
    y = jnp.dot(a, wa_ref[...], preferred_element_type=jnp.float32)
    y = y + jnp.dot(b, wb_ref[...], preferred_element_type=jnp.float32)
    mean = jnp.mean(y, axis=-1, keepdims=True)
    d = y - mean
    var = jnp.mean(d * d, axis=-1, keepdims=True)
    out = d * jax.lax.rsqrt(var + LN_EPS)
    out = out * g_ref[...] + bt_ref[...]
    o_ref[...] = out.astype(o_ref.dtype)      # 2-D output slab: no store reshape


# ----------------------------------------------------------------------------
# pallas_call wrappers
# ----------------------------------------------------------------------------
def _linear_ln_pallas(x_flat, wt, gamma, beta, *, single_buf, tpu_caps):
    """x_flat: (N, Cin); wt: (Cin, Cout). Returns (N, Cout) in x dtype."""
    n, cin = x_flat.shape
    cout = wt.shape[1]
    wt = wt.astype(x_flat.dtype)
    g2 = gamma.astype(jnp.float32).reshape(1, cout)
    b2 = beta.astype(jnp.float32).reshape(1, cout)

    act_sz = x_flat.dtype.itemsize
    sub = _sublane(x_flat.dtype)
    budget, limit_cap = tpu_caps
    w_bufs = 1 if single_buf else 2
    fixed = w_bufs * cin * cout * act_sz + 16 * cout * 4 + (2 << 20)
    per_row = 2 * (cin + cout) * act_sz + 8 * cout      # in/out blocks + f32 temps
    tm = _pick_row_tile(n, budget, fixed, per_row, sub)
    grid = (pl.cdiv(n, tm),)
    est = per_row * tm + fixed

    return pl.pallas_call(
        _linear_ln_kernel,
        out_shape=jax.ShapeDtypeStruct((n, cout), x_flat.dtype),
        grid_spec=pltpu.PrefetchScalarGridSpec(
            num_scalar_prefetch=0,
            grid=grid,
            in_specs=[
                pl.BlockSpec((tm, cin), lambda i: (i, 0)),
                _const_spec((cin, cout), single_buf),
                _const_spec((1, cout), single_buf),
                _const_spec((1, cout), single_buf),
            ],
            out_specs=pl.BlockSpec((tm, cout), lambda i: (i, 0)),
        ),
        compiler_params=pltpu.CompilerParams(
            dimension_semantics=("parallel",),
            vmem_limit_bytes=_vmem_limit(est, limit_cap),
        ),
    )(x_flat, wt, g2, b2)


def _merge_linear_ln_pallas(xr, wa, wb, gamma, beta, *, single_buf, tpu_caps):
    """xr: (B*H/2, 2, W/2, 2C) free view of x.  Returns (B*H/2*W/2, Cout)."""
    bh2, _, w2, c2 = xr.shape
    cout = wa.shape[1]
    wa = wa.astype(xr.dtype)
    wb = wb.astype(xr.dtype)
    g2 = gamma.astype(jnp.float32).reshape(1, cout)
    b2 = beta.astype(jnp.float32).reshape(1, cout)

    act_sz = xr.dtype.itemsize
    sub = _sublane(xr.dtype)
    budget, limit_cap = tpu_caps
    w_bufs = 1 if single_buf else 2
    fixed = 2 * w_bufs * c2 * cout * act_sz + 16 * cout * 4 + (2 << 20)
    per_tok = (4 * c2 + 2 * cout) * act_sz + 8 * cout   # a+b blocks, out, f32 temps
    m = sub // math.gcd(w2, sub)                        # makes tbh*w2 % sub == 0
    tbh = _pick_merge_tile(bh2, w2, budget, fixed, per_tok, m)
    grid = (pl.cdiv(bh2, tbh),)
    ntok = bh2 * w2
    est = per_tok * tbh * w2 + fixed

    return pl.pallas_call(
        _merge_linear_ln_kernel,
        out_shape=jax.ShapeDtypeStruct((ntok, cout), xr.dtype),
        grid_spec=pltpu.PrefetchScalarGridSpec(
            num_scalar_prefetch=0,
            grid=grid,
            in_specs=[
                # even H rows: concat([x0, x2], -1)
                pl.BlockSpec((tbh, None, w2, c2), lambda i: (i, 0, 0, 0)),
                # odd  H rows: concat([x1, x3], -1)
                pl.BlockSpec((tbh, None, w2, c2), lambda i: (i, 1, 0, 0)),
                _const_spec((c2, cout), single_buf),
                _const_spec((c2, cout), single_buf),
                _const_spec((1, cout), single_buf),
                _const_spec((1, cout), single_buf),
            ],
            out_specs=pl.BlockSpec((tbh * w2, cout), lambda i: (i, 0)),
        ),
        compiler_params=pltpu.CompilerParams(
            dimension_semantics=("parallel",),
            vmem_limit_bytes=_vmem_limit(est, limit_cap),
        ),
    )(xr, xr, wa, wb, g2, b2)


# ----------------------------------------------------------------------------
# PatchMerging forward
# ----------------------------------------------------------------------------
def patch_merging_forward(x, params, *, input_resolution, w_only):
    """x: (B, H*W, C) -> (B, H*W/2, 2C) if w_only else (B, H*W/4, 2C)."""
    single_buf = _single_buffer_supported()        # probed once, outside jit
    budget, limit_cap = _tpu_caps()
    return _patch_merging_jit(
        x, params,
        input_resolution=tuple(int(v) for v in input_resolution),
        w_only=int(w_only),
        single_buf=bool(single_buf),
        vmem_budget=int(budget),
        vmem_cap=int(limit_cap),
    )


@functools.partial(jax.jit, static_argnames=("input_resolution", "w_only",
                                              "single_buf", "vmem_budget",
                                              "vmem_cap"))
def _patch_merging_jit(x, params, *, input_resolution, w_only, single_buf,
                       vmem_budget, vmem_cap):
    H, W = input_resolution
    B, L, C = x.shape
    assert L == H * W, "input feature has wrong size"
    assert H % 2 == 0 and W % 2 == 0, f"x size ({H}*{W}) are not even."
    caps = (vmem_budget, vmem_cap)

    if w_only == 1:
        # concat([x[:, :, 0::2], x[:, :, 1::2]], -1).view(B, -1, 2C) is exactly
        # a free re-view of the contiguous (B, H, W, C) layout.
        xm = x.reshape(B * H * (W // 2), 2 * C)
        wt = jnp.transpose(params["linear1_w"])                # (2C, Cout)
        out = _linear_ln_pallas(xm, wt, params["norm1_g"], params["norm1_b"],
                                single_buf=single_buf, tpu_caps=caps)
        cout = params["linear1_w"].shape[0]
        return out.reshape(B, H * (W // 2), cout)

    # w_only == 0: xa + xd == concat([2*x0, x1+x2, x1+x2, 2*x3], -1).  Fold the
    # factors into the (tiny) weight so the kernel only needs two free views of x.
    wt = jnp.transpose(params["linear2_w"])                    # (4C, Cout)
    w0, w1, w2_, w3 = wt[:C], wt[C:2 * C], wt[2 * C:3 * C], wt[3 * C:]
    w12 = w1 + w2_
    wa = jnp.concatenate([2.0 * w0, w12], axis=0)              # (2C, Cout)
    wb = jnp.concatenate([w12, 2.0 * w3], axis=0)              # (2C, Cout)

    xr = x.reshape(B * (H // 2), 2, W // 2, 2 * C)             # free view
    out = _merge_linear_ln_pallas(xr, wa, wb,
                                  params["norm2_g"], params["norm2_b"],
                                  single_buf=single_buf, tpu_caps=caps)
    cout = params["linear2_w"].shape[0]
    return out.reshape(B, (H // 2) * (W // 2), cout)


# ----------------------------------------------------------------------------
# params + pure-JAX reference (mirrors the PyTorch module)
# ----------------------------------------------------------------------------
def init_patch_merging_params(key, dim):
    k1, k2, k3, k4 = jax.random.split(key, 4)
    linear1_w = (jax.random.normal(k1, (2 * dim, 2 * dim), jnp.float32)
                 / jnp.sqrt(2.0 * dim))
    linear2_w = (jax.random.normal(k2, (2 * dim, 4 * dim), jnp.float32)
                 / jnp.sqrt(4.0 * dim))
    norm1_g = 1.0 + 0.1 * jax.random.normal(k3, (2 * dim,), jnp.float32)
    norm1_b = 0.1 * jax.random.normal(k4, (2 * dim,), jnp.float32)
    norm2_g = 1.0 + 0.05 * jax.random.normal(k3, (2 * dim,), jnp.float32)
    norm2_b = 0.05 * jax.random.normal(k4, (2 * dim,), jnp.float32)
    return dict(linear1_w=linear1_w, linear2_w=linear2_w,
                norm1_g=norm1_g, norm1_b=norm1_b,
                norm2_g=norm2_g, norm2_b=norm2_b)


def _reference_forward(x, params, *, input_resolution, w_only):
    H, W = input_resolution
    B, L, C = x.shape
    xv = x.reshape(B, H, W, C)
    if w_only == 1:
        xm = jnp.concatenate([xv[:, :, 0::2, :], xv[:, :, 1::2, :]], -1)
        xm = xm.reshape(B, -1, 2 * C)
        w, g, b = params["linear1_w"], params["norm1_g"], params["norm1_b"]
    else:
        x0 = xv[:, 0::2, 0::2, :]
        x1 = xv[:, 1::2, 0::2, :]
        x2 = xv[:, 0::2, 1::2, :]
        x3 = xv[:, 1::2, 1::2, :]
        xa = jnp.concatenate([x0, x1, x2, x3], -1)
        xd = jnp.concatenate([x0, x2, x1, x3], -1)
        xm = (xa + xd).reshape(B, -1, 4 * C)
        w, g, b = params["linear2_w"], params["norm2_g"], params["norm2_b"]
    y = xm.astype(jnp.float32) @ w.T.astype(jnp.float32)
    mu = jnp.mean(y, -1, keepdims=True)
    var = jnp.mean((y - mu) ** 2, -1, keepdims=True)
    return (y - mu) * jax.lax.rsqrt(var + LN_EPS) * g + b


# ----------------------------------------------------------------------------
# demo / self-check
# ----------------------------------------------------------------------------
if __name__ == "__main__":
    key = jax.random.PRNGKey(0)
    ok = True

    # A tiny config (dim=4) and a realistic lane-width config (dim=96).
    for (B, H, W, C) in ((2, 16, 16, 4), (2, 16, 16, 96)):
        kx, kp = jax.random.split(jax.random.fold_in(key, C))
        x = jax.random.normal(kx, (B, H * W, C), jnp.float32)
        params = init_patch_merging_params(kp, C)
        for w_only in (1, 0):
            out = patch_merging_forward(
                x, params, input_resolution=(H, W), w_only=w_only)
            out = jax.block_until_ready(out)
            ref = _reference_forward(
                x, params, input_resolution=(H, W), w_only=w_only)
            expected = (B, H * W // 2, 2 * C) if w_only == 1 else (B, H * W // 4, 2 * C)
            ok &= out.shape == expected
            # Tolerance covers TPU default-precision differences between the XLA
            # reference matmul and the in-kernel MXU matmul (both f32-accumulated).
            ok &= bool(jnp.allclose(out, ref, atol=3e-2, rtol=3e-2))

    # bf16 activations/weights: bf16 MXU matmul with f32 accumulation, f32 LN.
    B, H, W, C = 2, 16, 16, 96
    kx, kp = jax.random.split(jax.random.fold_in(key, 1000 + C))
    x = jax.random.normal(kx, (B, H * W, C), jnp.float32)
    params = init_patch_merging_params(kp, C)
    x_bf = x.astype(jnp.bfloat16)
    params_bf = dict(params, linear1_w=params["linear1_w"].astype(jnp.bfloat16))
    out_bf = patch_merging_forward(
        x_bf, params_bf, input_resolution=(H, W), w_only=1)
    out_bf = jax.block_until_ready(out_bf)
    ref_bf = _reference_forward(
        x_bf, params_bf, input_resolution=(H, W), w_only=1)
    ok &= out_bf.dtype == jnp.bfloat16
    ok &= bool(jnp.allclose(out_bf.astype(jnp.float32), ref_bf,
                            atol=7e-2, rtol=7e-2))

    print("KERNEL_OK" if ok else "MISMATCH")
</pallas_src>

<mosaic_0001>
module attributes {stable_mosaic.version = 11 : i64} {
  func.func @_probe(%arg0: i32, %arg1: memref<8x128xf32, #tpu.memory_space<vmem>>, %arg2: memref<8x128xf32, #tpu.memory_space<vmem>>) attributes {dimension_semantics = [#tpu.dimension_semantics<arbitrary>], iteration_bounds = array<i64: 2>, scalar_prefetch = 0 : i64, scratch_operands = 0 : i64, tpu.core_type = #tpu.core_type<tc>, window_params = [{pipeline_mode = #tpu.pipeline_mode<synchronous>, transform_indices = @transform_0, window_bounds = array<i64: 8, 128>}, {pipeline_mode = #tpu.pipeline_mode<synchronous>, transform_indices = @transform_1, window_bounds = array<i64: 8, 128>}]} {
    %c0 = arith.constant 0 : index
    %c0_0 = arith.constant 0 : index
    %0 = vector.load %arg1[%c0, %c0_0] : memref<8x128xf32, #tpu.memory_space<vmem>>, vector<8x128xf32>
    %cst = arith.constant 1.000000e+00 : f32
    %1 = vector.broadcast %cst : f32 to vector<8x128xf32>
    %2 = arith.addf %0, %1 : vector<8x128xf32>
    %c0_1 = arith.constant 0 : index
    %c0_2 = arith.constant 0 : index
    %3 = vector.load %arg2[%c0_1, %c0_2] : memref<8x128xf32, #tpu.memory_space<vmem>>, vector<8x128xf32>
    tpu.vector_store %arg2[%c0_1, %c0_2], %2 {strides = array<i32>} : memref<8x128xf32, #tpu.memory_space<vmem>>, vector<8x128xf32>,
    return
  }
  func.func @transform_0(%arg0: i32) -> (i32, i32) {
    %c0_i32 = arith.constant 0 : i32
    %c0_i32_0 = arith.constant 0 : i32
    %c0_i32_1 = arith.constant 0 : i32
    return %c0_i32, %c0_i32_0 : i32, i32
  }
  func.func @transform_1(%arg0: i32) -> (i32, i32) {
    %c0_i32 = arith.constant 0 : i32
    %c0_i32_0 = arith.constant 0 : i32
    %c0_i32_1 = arith.constant 0 : i32
    return %c0_i32, %c0_i32_0 : i32, i32
  }
}

module attributes {stable_mosaic.version = 11 : i64} {
  func.func @_linear_ln_kernel(%arg0: i32, %arg1: memref<256x8xf32, #tpu.memory_space<vmem>>, %arg2: memref<8x8xf32, #tpu.memory_space<vmem>>, %arg3: memref<1x8xf32, #tpu.memory_space<vmem>>, %arg4: memref<1x8xf32, #tpu.memory_space<vmem>>, %arg5: memref<256x8xf32, #tpu.memory_space<vmem>>) attributes {dimension_semantics = [#tpu.dimension_semantics<parallel>], iteration_bounds = array<i64: 1>, scalar_prefetch = 0 : i64, scratch_operands = 0 : i64, tpu.core_type = #tpu.core_type<tc>, window_params = [{transform_indices = @transform_0, window_bounds = array<i64: 256, 8>}, {pipeline_mode = #tpu.pipeline_mode<synchronous>, transform_indices = @transform_1, window_bounds = array<i64: 8, 8>}, {pipeline_mode = #tpu.pipeline_mode<synchronous>, transform_indices = @transform_2, window_bounds = array<i64: 1, 8>}, {pipeline_mode = #tpu.pipeline_mode<synchronous>, transform_indices = @transform_3, window_bounds = array<i64: 1, 8>}, {transform_indices = @transform_4, window_bounds = array<i64: 256, 8>}]} {
    %c0 = arith.constant 0 : index
    %c0_0 = arith.constant 0 : index
    %0 = vector.load %arg1[%c0, %c0_0] : memref<256x8xf32, #tpu.memory_space<vmem>>, vector<256x8xf32>
    %c0_1 = arith.constant 0 : index
    %c0_2 = arith.constant 0 : index
    %1 = vector.load %arg2[%c0_1, %c0_2] : memref<8x8xf32, #tpu.memory_space<vmem>>, vector<8x8xf32>
    %cst = arith.constant dense<0.000000e+00> : vector<256x8xf32>
    %2 = tpu.matmul %0, %1, %cst {dimension_numbers = #tpu.dot_dimension_numbers<[1], [0], [0], [1], [0, 0, 1, 1], [], []>} : vector<256x8xf32>, vector<8x8xf32>, vector<256x8xf32> -> vector<256x8xf32>
    %cst_3 = arith.constant dense<0.000000e+00> : vector<256xf32>
    %3 = vector.multi_reduction <add>, %2, %cst_3 [1] : vector<256x8xf32> to vector<256xf32>
    %4 = vector.shape_cast %3 : vector<256xf32> to vector<256x1xf32>
    %cst_4 = arith.constant 8.000000e+00 : f32
    %5 = vector.broadcast %cst_4 : f32 to vector<256x1xf32>
    %6 = arith.divf %4, %5 : vector<256x1xf32>
    %7 = vector.broadcast %6 : vector<256x1xf32> to vector<256x8xf32>
    %8 = arith.subf %2, %7 : vector<256x8xf32>
    %9 = arith.mulf %8, %8 : vector<256x8xf32>
    %cst_5 = arith.constant dense<0.000000e+00> : vector<256xf32>
    %10 = vector.multi_reduction <add>, %9, %cst_5 [1] : vector<256x8xf32> to vector<256xf32>
    %11 = vector.shape_cast %10 : vector<256xf32> to vector<256x1xf32>
    %cst_6 = arith.constant 8.000000e+00 : f32
    %12 = vector.broadcast %cst_6 : f32 to vector<256x1xf32>
    %13 = arith.divf %11, %12 : vector<256x1xf32>
    %cst_7 = arith.constant 9.99999974E-6 : f32
    %14 = vector.broadcast %cst_7 : f32 to vector<256x1xf32>
    %15 = arith.addf %13, %14 : vector<256x1xf32>
    %16 = math.rsqrt %15 : vector<256x1xf32>
    %17 = vector.broadcast %16 : vector<256x1xf32> to vector<256x8xf32>
    %18 = arith.mulf %8, %17 : vector<256x8xf32>
    %c0_8 = arith.constant 0 : index
    %c0_9 = arith.constant 0 : index
    %19 = vector.load %arg3[%c0_8, %c0_9] : memref<1x8xf32, #tpu.memory_space<vmem>>, vector<1x8xf32>
    %20 = vector.broadcast %19 : vector<1x8xf32> to vector<256x8xf32>
    %21 = arith.mulf %18, %20 : vector<256x8xf32>
    %c0_10 = arith.constant 0 : index
    %c0_11 = arith.constant 0 : index
    %22 = vector.load %arg4[%c0_10, %c0_11] : memref<1x8xf32, #tpu.memory_space<vmem>>, vector<1x8xf32>
    %23 = vector.broadcast %22 : vector<1x8xf32> to vector<256x8xf32>
    %24 = arith.addf %21, %23 : vector<256x8xf32>
    %c0_12 = arith.constant 0 : index
    %c0_13 = arith.constant 0 : index
    %25 = vector.load %arg5[%c0_12, %c0_13] : memref<256x8xf32, #tpu.memory_space<vmem>>, vector<256x8xf32>
    tpu.vector_store %arg5[%c0_12, %c0_13], %24 {strides = array<i32>} : memref<256x8xf32, #tpu.memory_space<vmem>>, vector<256x8xf32>,
    return
  }
  func.func @transform_0(%arg0: i32) -> (i32, i32) {
    %c0_i32 = arith.constant 0 : i32
    %c0_i32_0 = arith.constant 0 : i32
    return %arg0, %c0_i32 : i32, i32
  }
  func.func @transform_1(%arg0: i32) -> (i32, i32) {
    %c0_i32 = arith.constant 0 : i32
    %c0_i32_0 = arith.constant 0 : i32
    %c0_i32_1 = arith.constant 0 : i32
    return %c0_i32, %c0_i32_0 : i32, i32
  }
  func.func @transform_2(%arg0: i32) -> (i32, i32) {
    %c0_i32 = arith.constant 0 : i32
    %c0_i32_0 = arith.constant 0 : i32
    %c0_i32_1 = arith.constant 0 : i32
    return %c0_i32, %c0_i32_0 : i32, i32
  }
  func.func @transform_3(%arg0: i32) -> (i32, i32) {
    %c0_i32 = arith.constant 0 : i32
    %c0_i32_0 = arith.constant 0 : i32
    %c0_i32_1 = arith.constant 0 : i32
    return %c0_i32, %c0_i32_0 : i32, i32
  }
  func.func @transform_4(%arg0: i32) -> (i32, i32) {
    %c0_i32 = arith.constant 0 : i32
    %c0_i32_0 = arith.constant 0 : i32
    return %arg0, %c0_i32 : i32, i32
  }
}

</mosaic_0001>

<bundles_post_ra>
// kernel: tpu_custom_call.1
= control target key start
LH: loop header
LB: loop body
LE: loop exit
PB: predicated region body
PF: predicated region fallthrough
CT: control target
= control target key end

     0   :  { %6 = vsyncpa [#allocation3], 0  ;;  %s341_s0 = inlined_call_operand.hbm [shape: f32[8,128], index: 0, kind: input, shape index: {}]   ;;  %s342_s1 = inlined_call_operand.hbm [shape: f32[8,128], index: 1, kind: output, shape index: {}]  }
   0x1   :  { %7 = vsyncpa [#allocation4], 0  ;;  %s262_s6 = smov 0  }
   0x2 LB: > { %s145_s7 = sadd.s32 4294967295, %s248_s6   ;;  %p146_p0 = scmp.ge.s32.totalorder %s248_s6, 1  ;;  %s248_s6 = sphi %s262_s6, %s13_s6  }
   0x3   : > { %p60_p1 = scmp.lt.s32.totalorder %s248_s6, 3  ;;  %p276_p3 = scmp.eq.s32.totalorder %s145_s7, 0 }
   0x4   : > { %s250_s10 = smov [#allocation2]   ;;  %s180_s15 = scalar_lea.hbm %s341_s0, 128 }
   0x5   : > { %p270_p2 = pnand %p146_p0, %p60_p1  ;;  %s73_s11 = sshll.u32 %s250_s10, 4  ;;  %s74_s11 = int_to_ptr.vmem [resolvable:$true] %s73_s11 }
   0x6   : > { %s347_s9 = scalar_select %p276_p3, 1, 0 }
   0x7   : > { %s346_s8 = scalar_select %p270_p2, 1, 0 }
   0x8   : > { %p162_p4 = pneg %p270_p2  ;;  %p181_p6 = scmp.ne.s32.totalorder %s341_s0, %s180_s15 }
   0x9   : > { %p187_p10 = scmp.lt.u32.totalorder %s180_s15, %s341_s0 }
   0xa   : > { %p284_p5 = pnand %p276_p3, %p162_p4 }
   0xc   : > { %p182_p7 = pneg %p284_p5 }
   0xe   : > { %p183_p8 = pnand %p182_p7, %p181_p6 }
  0x10   : > { %p184_p9 = pneg %p183_p8 }
  0x12   : > { %p189_p11 = pnand %p187_p10, %p184_p9 }
  0x14   : > { %192 = shalt.err (!%p189_p11)
}
  0x15   : > { %s193_s20 = scalar_lea.vmem %s74_s11, 128  ;;  %p201_p1 = scmp.lt.s32.totalorder %s74_s11, %s74_s11 }
  0x16   : > { %p194_p12 = scmp.ne.s32.totalorder %s74_s11, %s193_s20  ;;  %p202_p4 = scmp.lt.s32.totalorder %s193_s20, %s193_s20 }
  0x18   : > { %p196_p13 = pnand %p194_p12, %p182_p7  ;;  %p203_p3 = por %p202_p4, %p201_p1 }
  0x1a   : > { %p197_p0 = pneg %p196_p13 }
  0x1c   : > { %p204_p2 = pnand %p203_p3, %p197_p0 }
  0x1e   : > { %207 = shalt.err (!%p204_p2)
}
  0x1f   : > { %165 = dma.hbm_to_vmem [thread:$0]  (!%p284_p5), %s341_s0, 128, %s74_s11, [#allocation3]  }
  0x20   : > { %p349_p6 = scmp.ne.s32.totalorder %s346_s8, 0 }
  0x21   : > { %p350_p8 = scmp.ne.s32.totalorder (!%p349_p6), %s347_s9, 0 }
  0x22   : > { %86 = sbr.rel (%p349_p6) target bundleno = 67 (0x43), region = 24 }
  0x29   : > { %239 = dma.done.wait (%p350_p8), [#allocation3], 128  }
  0x2a   : > { %241 = vsyncadd (%p350_p8), [#allocation3], 4294967168  ;;  %s251_s23 = smov [#allocation5]   ;;  %v96_v0 = vld [vmem:[#allocation2] sm:$0xff]  ;;  %p312_p2 = scmp.eq.s32.totalorder %s145_s7, 1 }
  0x2b   : > { %s106_s24 = sshll.u32 %s251_s23, 4  ;;  %v97_v1 = vadd.f32 1.0, %v96_v0  ;;  %s107_s24 = int_to_ptr.vmem [resolvable:$true] %s106_s24 }
  0x2c   : > { %s208_s26 = scalar_lea.vmem %s107_s24, 128  ;;  %p215_p9 = scmp.lt.s32.totalorder %s107_s24, %s107_s24 }
  0x2d   : > { %98 = vst [vmem:[#allocation5] sm:$0xff] %v97_v1  ;;  %p209_p3 = scmp.ne.s32.totalorder %s107_s24, %s208_s26  ;;  %p216_p10 = scmp.lt.s32.totalorder %s208_s26, %s208_s26 }
  0x2f   : > { %p210_p5 = pnand %p209_p3, %p312_p2  ;;  %p217_p11 = por %p216_p10, %p215_p9 }
  0x31   : > { %p211_p7 = pneg %p210_p5 }
  0x33   : > { %p218_p12 = pnand %p217_p11, %p211_p7 }
  0x35   : > { %221 = shalt.err (!%p218_p12)
}
  0x36   : > { %s222_s29 = scalar_lea.hbm %s342_s1, 128 }
  0x37   : > { %p223_p13 = scmp.ne.s32.totalorder %s342_s1, %s222_s29  ;;  %p228_p4 = scmp.lt.u32.totalorder %s222_s29, %s342_s1 }
  0x39   : > { %p224_p0 = pnand %p223_p13, %p312_p2 }
  0x3b   : > { %p225_p1 = pneg %p224_p0 }
  0x3d   : > { %p230_p6 = pnand %p228_p4, %p225_p1 }
  0x3f   : > { %233 = shalt.err (!%p230_p6)
}
  0x40   : > { %159 = dma.vmem_to_hbm [thread:$0]  (%p312_p2), %s107_s24, 128, %s342_s1, [#allocation4]  }
  0x41   : > { %243 = dma.done.wait (%p312_p2), [#allocation4], 128  }
  0x42   : > { %245 = vsyncadd (%p312_p2), [#allocation4], 4294967168 }
  0x43 PF: > { %s13_s6 = sadd.s32 1, %s248_s6  }
  0x44   : > { %p10_p8 = scmp.ge.s32.totalorder %s13_s6, 4  }
  0x46   :  { %12 = sbr.rel (!%p10_p8) target bundleno = 2 (0x2), region = 53 }
  0x4d   :  { %119 = vsyncpa [#allocation3], 1 }
  0x4e   :  { %121 = vsyncpa [#allocation3 + $0x1], 1 }
  0x4f   :  { %122 = vsyncpa [#allocation4], 1 }
  0x50   :  { %124 = vsyncpa [#allocation4 + $0x1], 1 }

// kernel: _patch_merging_jit.1
= control target key start
LH: loop header
LB: loop body
LE: loop exit
PB: predicated region body
PF: predicated region fallthrough
CT: control target
= control target key end

     0   :  { %vm50_vm0 = vcmask 64512   ;;  %s1796_s1 = inlined_call_operand.vmem [shape: f32[8,8], index: 1, kind: input, shape index: {}]   ;;  %s1797_s0 = inlined_call_operand.vmem [shape: f32[256,8], index: 0, kind: input, shape index: {}]   ;;  %s1798_s2 = inlined_call_operand.vmem [shape: f32[1,8], index: 2, kind: input, shape index: {}]   ;;  %s1799_s3 = inlined_call_operand.vmem [shape: f32[1,8], index: 3, kind: input, shape index: {}]   ;;  %s1800_s4 = inlined_call_operand.vmem [shape: f32[256,8], index: 4, kind: output, shape index: {}]  }
   0x1   :  { %v49_v0 = vld [vmem:[%s1796_s1] sm:$0xff]  ;;  %v18_v3 = vld [vmem:[%s1797_s0 + $0x8] sm:$0xff]  ;;  %v19_v5 = vld [vmem:[%s1797_s0 + $0x10] sm:$0xff] }
   0x2   :  { %v17_v1 = vld [vmem:[%s1797_s0] sm:$0xff]  ;;  %970 = vmatprep.subr.mxu0 %v49_v0  ;;  %1020 = vmatprep.subr.mxu1 %v49_v0  ;;  %v34_v4 = vld [vmem:[%s1797_s0 + $0x88] sm:$0xff]  ;;  %v35_v6 = vld [vmem:[%s1797_s0 + $0x90] sm:$0xff] }
   0x3   :  { %v33_v2 = vld [vmem:[%s1797_s0 + $0x80] sm:$0xff]  ;;  %971 = vmatpush3.msra.mxu0 %v49_v0  ;;  %1021 = vmatpush3.msra.mxu1 %v49_v0  ;;  %v20_v7 = vld [vmem:[%s1797_s0 + $0x18] sm:$0xff]  ;;  %v22_v11 = vld [vmem:[%s1797_s0 + $0x28] sm:$0xff] }
   0x4   :  { %972 = vmatprep.mubr.msk.f32.mxu0 %vm50_vm0, %v17_v1  ;;  %996 = vmatprep.mubr.msk.f32.mxu1 %vm50_vm0, %v33_v2  ;;  %v36_v8 = vld [vmem:[%s1797_s0 + $0x98] sm:$0xff]  ;;  %v21_v9 = vld [vmem:[%s1797_s0 + $0x20] sm:$0xff]  ;;  %v38_v12 = vld [vmem:[%s1797_s0 + $0xa8] sm:$0xff] }
   0x5   :  { %973 = vmatmul.mubr.msk.f32.vlgmr.msra.gmra.mrb[0].mxu0 %vm50_vm0, %v18_v3  ;;  %997 = vmatmul.mubr.msk.f32.vlgmr.msra.gmra.mrb[0].mxu1 %vm50_vm0, %v34_v4  ;;  %v37_v10 = vld [vmem:[%s1797_s0 + $0xa0] sm:$0xff]  ;;  %v23_v13 = vld [vmem:[%s1797_s0 + $0x30] sm:$0xff]  ;;  %v24_v15 = vld [vmem:[%s1797_s0 + $0x38] sm:$0xff] }
   0x6   :  { %975 = vmatprep.mubr.msk.f32.mxu0 %vm50_vm0, %v19_v5  ;;  %999 = vmatprep.mubr.msk.f32.mxu1 %vm50_vm0, %v35_v6  ;;  %v39_v14 = vld [vmem:[%s1797_s0 + $0xb0] sm:$0xff]  ;;  %v40_v16 = vld [vmem:[%s1797_s0 + $0xb8] sm:$0xff]  ;;  %v25_v17 = vld [vmem:[%s1797_s0 + $0x40] sm:$0xff] }
   0x7   :  { %v41_v18 = vld [vmem:[%s1797_s0 + $0xc0] sm:$0xff]  ;;  %v26_v19 = vld [vmem:[%s1797_s0 + $0x48] sm:$0xff]  ;;  %v27_v21 = vld [vmem:[%s1797_s0 + $0x50] sm:$0xff] }
   0x8   :  { %v42_v20 = vld [vmem:[%s1797_s0 + $0xc8] sm:$0xff]  ;;  %v43_v22 = vld [vmem:[%s1797_s0 + $0xd0] sm:$0xff]  ;;  %v28_v23 = vld [vmem:[%s1797_s0 + $0x58] sm:$0xff] }
   0x9   :  { %976 = vmatmul.mubr.msk.f32.gmra.mrb[2].mxu0 %vm50_vm0, %v20_v7  ;;  %1000 = vmatmul.mubr.msk.f32.gmra.mrb[2].mxu1 %vm50_vm0, %v36_v8  ;;  %v44_v24 = vld [vmem:[%s1797_s0 + $0xd8] sm:$0xff]  ;;  %v29_v25 = vld [vmem:[%s1797_s0 + $0x60] sm:$0xff]  ;;  %v30_v27 = vld [vmem:[%s1797_s0 + $0x68] sm:$0xff] }
   0xa   :  { %978 = vmatprep.mubr.msk.f32.mxu0 %vm50_vm0, %v21_v9  ;;  %1002 = vmatprep.mubr.msk.f32.mxu1 %vm50_vm0, %v37_v10  ;;  %v45_v26 = vld [vmem:[%s1797_s0 + $0xe0] sm:$0xff]  ;;  %v46_v28 = vld [vmem:[%s1797_s0 + $0xe8] sm:$0xff]  ;;  %v31_v29 = vld [vmem:[%s1797_s0 + $0x70] sm:$0xff] }
   0xb   :  { %v47_v30 = vld [vmem:[%s1797_s0 + $0xf0] sm:$0xff]  ;;  %v32_v31 = vld [vmem:[%s1797_s0 + $0x78] sm:$0xff] }
   0xc   :  { %v48_v32 = vld [vmem:[%s1797_s0 + $0xf8] sm:$0xff] }
   0xd   :  { %979 = vmatmul.mubr.msk.f32.gmra.mrb[4].mxu0 %vm50_vm0, %v22_v11  ;;  %1003 = vmatmul.mubr.msk.f32.gmra.mrb[4].mxu1 %vm50_vm0, %v38_v12 }
   0xe   :  { %981 = vmatprep.mubr.msk.f32.mxu0 %vm50_vm0, %v23_v13  ;;  %1005 = vmatprep.mubr.msk.f32.mxu1 %vm50_vm0, %v39_v14 }
  0x11   :  { %982 = vmatmul.mubr.msk.f32.gmra.mrb[6].mxu0 %vm50_vm0, %v24_v15  ;;  %1006 = vmatmul.mubr.msk.f32.gmra.mrb[6].mxu1 %vm50_vm0, %v40_v16 }
  0x12   :  { %984 = vmatprep.mubr.msk.f32.mxu0 %vm50_vm0, %v25_v17  ;;  %1008 = vmatprep.mubr.msk.f32.mxu1 %vm50_vm0, %v41_v18 }
  0x15   :  { %985 = vmatmul.mubr.msk.f32.gmra.mrb[8].mxu0 %vm50_vm0, %v26_v19  ;;  %1009 = vmatmul.mubr.msk.f32.gmra.mrb[8].mxu1 %vm50_vm0, %v42_v20 }
  0x16   :  { %987 = vmatprep.mubr.msk.f32.mxu0 %vm50_vm0, %v27_v21  ;;  %1011 = vmatprep.mubr.msk.f32.mxu1 %vm50_vm0, %v43_v22 }
  0x19   :  { %988 = vmatmul.mubr.msk.f32.gmra.mrb[10].mxu0 %vm50_vm0, %v28_v23  ;;  %1012 = vmatmul.mubr.msk.f32.gmra.mrb[10].mxu1 %vm50_vm0, %v44_v24 }
  0x1a   :  { %990 = vmatprep.mubr.msk.f32.mxu0 %vm50_vm0, %v29_v25  ;;  %1014 = vmatprep.mubr.msk.f32.mxu1 %vm50_vm0, %v45_v26 }
  0x1d   :  { %991 = vmatmul.mubr.msk.f32.gmra.mrb[12].mxu0 %vm50_vm0, %v30_v27  ;;  %1015 = vmatmul.mubr.msk.f32.gmra.mrb[12].mxu1 %vm50_vm0, %v46_v28 }
  0x1e   :  { %993 = vmatprep.mubr.msk.f32.mxu0 %vm50_vm0, %v31_v29  ;;  %1017 = vmatprep.mubr.msk.f32.mxu1 %vm50_vm0, %v47_v30 }
  0x21   :  { %994 = vmatmul.mubr.msk.f32.gmra.mrb[14].mxu0 %vm50_vm0, %v32_v31  ;;  %1018 = vmatmul.mubr.msk.f32.gmra.mrb[14].mxu1 %vm50_vm0, %v48_v32 }
  0xd8   :  { %v1242_v33 = vpop.f32.mrb[0].mxu0  ;;  %v1244_v34 = vpop.f32.mrb[0].mxu1 }
  0xd9   :  { %v1246_v35 = vpop.f32.mrb[1].mxu0  ;;  %v1248_v36 = vpop.f32.mrb[1].mxu1  ;;  %v423_v37 = vsel %vm50_vm0, %v1244_v34, 0.0  ;;  %v375_v38 = vsel %vm50_vm0, %v1242_v33, 0.0 }
  0xda   :  { %424 = vadd.xlane.f32.xlu1 %v423_v37  ;;  %376 = vadd.xlane.f32.xlu0 %v375_v38  ;;  %v372_v42 = vsel %vm50_vm0, %v1246_v35, 0.0  ;;  %v420_v48 = vsel %vm50_vm0, %v1248_v36, 0.0 }
  0xdc   :  { %v1254_v39 = vpop.f32.mrb[2].mxu0  ;;  %v1256_v40 = vpop.f32.mrb[2].mxu1 }
  0xdd   :  { %v1258_v41 = vpop.f32.mrb[3].mxu0  ;;  %v381_v43 = vsel %vm50_vm0, %v1254_v39, 0.0  ;;  %v1264_v44 = vpop.f32.mrb[3].mxu1  ;;  %v429_v45 = vsel %vm50_vm0, %v1256_v40, 0.0 }
  0xde   :  { %373 = vadd.xlane.f32.xlu0 %v372_v42  ;;  %382 = vadd.xlane.f32.xlu1 %v381_v43  ;;  %v426_v53 = vsel %vm50_vm0, %v1264_v44, 0.0  ;;  %v378_v54 = vsel %vm50_vm0, %v1258_v41, 0.0 }
  0xe0   :  { %v1268_v46 = vpop.f32.mrb[4].mxu0  ;;  %v1270_v47 = vpop.f32.mrb[4].mxu1 }
  0xe1   :  { %v1274_v49 = vpop.f32.mrb[5].mxu0  ;;  %v1276_v50 = vpop.f32.mrb[5].mxu1  ;;  %v387_v57 = vsel %vm50_vm0, %v1268_v46, 0.0  ;;  %v435_v63 = vsel %vm50_vm0, %v1270_v47, 0.0 }
  0xe2   :  { %421 = vadd.xlane.f32.xlu0 %v420_v48  ;;  %430 = vadd.xlane.f32.xlu1 %v429_v45  ;;  %v384_v58 = vsel %vm50_vm0, %v1274_v49, 0.0  ;;  %v432_v0 = vsel %vm50_vm0, %v1276_v50, 0.0 }
  0xe4   :  { %v1278_v51 = vpop.f32.mrb[6].mxu0  ;;  %v1280_v52 = vpop.f32.mrb[6].mxu1 }
  0xe5   :  { %v1286_v55 = vpop.f32.mrb[7].mxu0  ;;  %v1288_v56 = vpop.f32.mrb[7].mxu1  ;;  %v393_v5 = vsel %vm50_vm0, %v1278_v51, 0.0  ;;  %v441_v11 = vsel %vm50_vm0, %v1280_v52, 0.0 }
  0xe6   :  { %427 = vadd.xlane.f32.xlu0 %v426_v53  ;;  %379 = vadd.xlane.f32.xlu1 %v378_v54  ;;  %v390_v6 = vsel %vm50_vm0, %v1286_v55, 0.0  ;;  %v438_v12 = vsel %vm50_vm0, %v1288_v56, 0.0 }
  0xe8   :  { %v1294_v59 = vpop.f32.mrb[8].mxu0  ;;  %v1296_v60 = vpop.f32.mrb[8].mxu1 }
  0xe9   :  { %v1298_v61 = vpop.f32.mrb[9].mxu0  ;;  %v1300_v62 = vpop.f32.mrb[9].mxu1  ;;  %v399_v17 = vsel %vm50_vm0, %v1294_v59, 0.0  ;;  %v447_v19 = vsel %vm50_vm0, %v1296_v60, 0.0 }
  0xea   :  { %388 = vadd.xlane.f32.xlu1 %v387_v57  ;;  %385 = vadd.xlane.f32.xlu0 %v384_v58  ;;  %v396_v18 = vsel %vm50_vm0, %v1298_v61, 0.0  ;;  %v444_v20 = vsel %vm50_vm0, %v1300_v62, 0.0 }
  0xec   :  { %v1306_v1 = vpop.f32.mrb[10].mxu0  ;;  %v1308_v2 = vpop.f32.mrb[10].mxu1 }
  0xed   :  { %v1310_v3 = vpop.f32.mrb[11].mxu0  ;;  %v1312_v4 = vpop.f32.mrb[11].mxu1  ;;  %v405_v21 = vsel %vm50_vm0, %v1306_v1, 0.0  ;;  %v453_v23 = vsel %vm50_vm0, %v1308_v2, 0.0 }
  0xee   :  { %436 = vadd.xlane.f32.xlu1 %v435_v63  ;;  %433 = vadd.xlane.f32.xlu0 %v432_v0  ;;  %v402_v22 = vsel %vm50_vm0, %v1310_v3, 0.0  ;;  %v450_v24 = vsel %vm50_vm0, %v1312_v4, 0.0 }
  0xf0   :  { %v1318_v7 = vpop.f32.mrb[12].mxu0  ;;  %v1320_v8 = vpop.f32.mrb[12].mxu1 }
  0xf1   :  { %v1322_v9 = vpop.f32.mrb[13].mxu0  ;;  %v1324_v10 = vpop.f32.mrb[13].mxu1  ;;  %v411_v25 = vsel %vm50_vm0, %v1318_v7, 0.0  ;;  %v459_v27 = vsel %vm50_vm0, %v1320_v8, 0.0 }
  0xf2   :  { %394 = vadd.xlane.f32.xlu1 %v393_v5  ;;  %391 = vadd.xlane.f32.xlu0 %v390_v6  ;;  %v408_v26 = vsel %vm50_vm0, %v1322_v9, 0.0  ;;  %v456_v28 = vsel %vm50_vm0, %v1324_v10, 0.0 }
  0xf4   :  { %v1330_v13 = vpop.f32.mrb[14].mxu0  ;;  %v1332_v14 = vpop.f32.mrb[14].mxu1 }
  0xf5   :  { %v1334_v15 = vpop.f32.mrb[15].mxu0  ;;  %v1336_v16 = vpop.f32.mrb[15].mxu1  ;;  %v417_v29 = vsel %vm50_vm0, %v1330_v13, 0.0  ;;  %v465_v31 = vsel %vm50_vm0, %v1332_v14, 0.0 }
  0xf6   :  { %442 = vadd.xlane.f32.xlu1 %v441_v11  ;;  %439 = vadd.xlane.f32.xlu0 %v438_v12  ;;  %v414_v30 = vsel %vm50_vm0, %v1334_v15, 0.0  ;;  %v462_v32 = vsel %vm50_vm0, %v1336_v16, 0.0 }
  0xfa   :  { %400 = vadd.xlane.f32.xlu1 %v399_v17  ;;  %397 = vadd.xlane.f32.xlu0 %v396_v18 }
  0xfe   :  { %448 = vadd.xlane.f32.xlu1 %v447_v19  ;;  %445 = vadd.xlane.f32.xlu0 %v444_v20 }
 0x102   :  { %406 = vadd.xlane.f32.xlu1 %v405_v21  ;;  %403 = vadd.xlane.f32.xlu0 %v402_v22 }
 0x106   :  { %454 = vadd.xlane.f32.xlu1 %v453_v23  ;;  %451 = vadd.xlane.f32.xlu0 %v450_v24 }
 0x10a   :  { %412 = vadd.xlane.f32.xlu1 %v411_v25  ;;  %409 = vadd.xlane.f32.xlu0 %v408_v26 }
 0x10e   :  { %460 = vadd.xlane.f32.xlu1 %v459_v27  ;;  %457 = vadd.xlane.f32.xlu0 %v456_v28 }
 0x112   :  { %418 = vadd.xlane.f32.xlu1 %v417_v29  ;;  %415 = vadd.xlane.f32.xlu0 %v414_v30 }
 0x116   :  { %466 = vadd.xlane.f32.xlu1 %v465_v31  ;;  %463 = vadd.xlane.f32.xlu0 %v462_v32 }
 0x167   :  { %v425_v37 = vpop.xlane.xlu1 %424  ;;  %v377_v38 = vpop.xlane.xlu0 %376 }
 0x168   :  { %v486_v42 = vmul.f32 0.125, %v425_v37  ;;  %v470_v43 = vmul.f32 0.125, %v377_v38 }
 0x16a   :  { %v1371_v45 = vsub.f32 %v1244_v34, %v486_v42  ;;  %v1374_v48 = vsub.f32 %v1242_v33, %v470_v43 }
 0x16b   :  { %v374_v53 = vpop.xlane.xlu0 %373  ;;  %v383_v54 = vpop.xlane.xlu1 %382 }
 0x16c   :  { %v469_v57 = vmul.f32 0.125, %v374_v53  ;;  %v472_v58 = vmul.f32 0.125, %v383_v54  ;;  %v534_v63 = vmul.f32 %v1374_v48, %v1374_v48  ;;  %v550_v34 = vmul.f32 %v1371_v45, %v1371_v45 }
 0x16e   :  { %v1379_v0 = vsub.f32 %v1246_v35, %v469_v57  ;;  %v1382_v5 = vsub.f32 %v1254_v39, %v472_v58  ;;  %v568_v6 = vsel %vm50_vm0, %v534_v63, 0.0  ;;  %v616_v20 = vsel %vm50_vm0, %v550_v34, 0.0 }
 0x16f   :  { %v422_v33 = vpop.xlane.xlu0 %421  ;;  %v431_v11 = vpop.xlane.xlu1 %430  ;;  %569 = vadd.xlane.f32.xlu1 %v568_v6 }
 0x170   :  { %v485_v12 = vmul.f32 0.125, %v422_v33  ;;  %v488_v17 = vmul.f32 0.125, %v431_v11  ;;  %v533_v18 = vmul.f32 %v1379_v0, %v1379_v0  ;;  %v536_v35 = vmul.f32 %v1382_v5, %v1382_v5 }
 0x172   :  { %v1392_v19 = vsub.f32 %v1248_v36, %v485_v12  ;;  %v1395_v39 = vsub.f32 %v1256_v40, %v488_v17  ;;  %v565_v21 = vsel %vm50_vm0, %v533_v18, 0.0  ;;  %v574_v27 = vsel %vm50_vm0, %v536_v35, 0.0 }
 0x173   :  { %v428_v22 = vpop.xlane.xlu0 %427  ;;  %v380_v23 = vpop.xlane.xlu1 %379  ;;  %617 = vadd.xlane.f32.xlu1 %v616_v20  ;;  %566 = vadd.xlane.f32.xlu0 %v565_v21 }
 0x174   :  { %v487_v24 = vmul.f32 0.125, %v428_v22  ;;  %v471_v25 = vmul.f32 0.125, %v380_v23  ;;  %v549_v26 = vmul.f32 %v1392_v19, %v1392_v19  ;;  %v552_v29 = vmul.f32 %v1395_v39, %v1395_v39 }
 0x176   :  { %v1403_v36 = vsub.f32 %v1264_v44, %v487_v24  ;;  %v1406_v40 = vsub.f32 %v1258_v41, %v471_v25  ;;  %v613_v28 = vsel %vm50_vm0, %v549_v26, 0.0  ;;  %v622_v43 = vsel %vm50_vm0, %v552_v29, 0.0 }
 0x177   :  { %v389_v30 = vpop.xlane.xlu1 %388  ;;  %v386_v31 = vpop.xlane.xlu0 %385  ;;  %575 = vadd.xlane.f32.xlu1 %v574_v27  ;;  %614 = vadd.xlane.f32.xlu0 %v613_v28 }
 0x178   :  { %v474_v32 = vmul.f32 0.125, %v389_v30  ;;  %v473_v37 = vmul.f32 0.125, %v386_v31  ;;  %v535_v38 = vmul.f32 %v1406_v40, %v1406_v40  ;;  %v551_v44 = vmul.f32 %v1403_v36, %v1403_v36 }
 0x17a   :  { %v1416_v41 = vsub.f32 %v1268_v46, %v474_v32  ;;  %v1419_v42 = vsub.f32 %v1274_v49, %v473_v37  ;;  %v571_v53 = vsel %vm50_vm0, %v535_v38, 0.0  ;;  %v619_v34 = vsel %vm50_vm0, %v551_v44, 0.0 }
 0x17b   :  { %v437_v54 = vpop.xlane.xlu1 %436  ;;  %v434_v57 = vpop.xlane.xlu0 %433  ;;  %623 = vadd.xlane.f32.xlu1 %v622_v43  ;;  %572 = vadd.xlane.f32.xlu0 %v571_v53 }
 0x17c   :  { %v490_v58 = vmul.f32 0.125, %v437_v54  ;;  %v489_v63 = vmul.f32 0.125, %v434_v57  ;;  %v538_v6 = vmul.f32 %v1416_v41, %v1416_v41  ;;  %v537_v11 = vmul.f32 %v1419_v42, %v1419_v42 }
 0x17e   :  { %v1427_v46 = vsub.f32 %v1270_v47, %v490_v58  ;;  %v1430_v49 = vsub.f32 %v1276_v50, %v489_v63  ;;  %v580_v33 = vsel %vm50_vm0, %v538_v6, 0.0  ;;  %v577_v23 = vsel %vm50_vm0, %v537_v11, 0.0 }
 0x17f   :  { %v395_v12 = vpop.xlane.xlu1 %394  ;;  %v392_v17 = vpop.xlane.xlu0 %391  ;;  %581 = vadd.xlane.f32.xlu1 %v580_v33  ;;  %620 = vadd.xlane.f32.xlu0 %v619_v34 }
 0x180   :  { %v476_v18 = vmul.f32 0.125, %v395_v12  ;;  %v475_v35 = vmul.f32 0.125, %v392_v17  ;;  %v554_v20 = vmul.f32 %v1427_v46, %v1427_v46  ;;  %v553_v47 = vmul.f32 %v1430_v49, %v1430_v49 }
 0x182   :  { %v1440_v50 = vsub.f32 %v1278_v51, %v476_v18  ;;  %v1443_v21 = vsub.f32 %v1286_v55, %v475_v35  ;;  %v628_v22 = vsel %vm50_vm0, %v554_v20, 0.0  ;;  %v625_v29 = vsel %vm50_vm0, %v553_v47, 0.0 }
 0x183   :  { %v443_v24 = vpop.xlane.xlu1 %442  ;;  %v440_v25 = vpop.xlane.xlu0 %439  ;;  %629 = vadd.xlane.f32.xlu1 %v628_v22  ;;  %578 = vadd.xlane.f32.xlu0 %v577_v23 }
 0x184   :  { %v492_v26 = vmul.f32 0.125, %v443_v24  ;;  %v491_v27 = vmul.f32 0.125, %v440_v25  ;;  %v540_v28 = vmul.f32 %v1440_v50, %v1440_v50  ;;  %v539_v31 = vmul.f32 %v1443_v21, %v1443_v21 }
 0x186   :  { %v1451_v51 = vsub.f32 %v1280_v52, %v492_v26  ;;  %v1454_v55 = vsub.f32 %v1288_v56, %v491_v27  ;;  %v586_v30 = vsel %vm50_vm0, %v540_v28, 0.0  ;;  %v583_v57 = vsel %vm50_vm0, %v539_v31, 0.0 }
 0x187   :  { %v401_v32 = vpop.xlane.xlu1 %400  ;;  %v398_v37 = vpop.xlane.xlu0 %397  ;;  %587 = vadd.xlane.f32.xlu1 %v586_v30  ;;  %626 = vadd.xlane.f32.xlu0 %v625_v29 }
 0x188   :  { %v478_v38 = vmul.f32 0.125, %v401_v32  ;;  %v477_v44 = vmul.f32 0.125, %v398_v37  ;;  %v556_v43 = vmul.f32 %v1451_v51, %v1451_v51  ;;  %v555_v52 = vmul.f32 %v1454_v55, %v1454_v55 }
 0x18a   :  { %v1464_v56 = vsub.f32 %v1294_v59, %v478_v38  ;;  %v1467_v53 = vsub.f32 %v1298_v61, %v477_v44  ;;  %v634_v54 = vsel %vm50_vm0, %v556_v43, 0.0  ;;  %v631_v11 = vsel %vm50_vm0, %v555_v52, 0.0 }
 0x18b   :  { %v449_v58 = vpop.xlane.xlu1 %448  ;;  %v446_v63 = vpop.xlane.xlu0 %445  ;;  %635 = vadd.xlane.f32.xlu1 %v634_v54  ;;  %584 = vadd.xlane.f32.xlu0 %v583_v57 }
 0x18c   :  { %v494_v6 = vmul.f32 0.125, %v449_v58  ;;  %v493_v34 = vmul.f32 0.125, %v446_v63  ;;  %v542_v33 = vmul.f32 %v1464_v56, %v1464_v56  ;;  %v541_v17 = vmul.f32 %v1467_v53, %v1467_v53 }
 0x18e   :  { %v1475_v59 = vsub.f32 %v1296_v60, %v494_v6  ;;  %v1478_v61 = vsub.f32 %v1300_v62, %v493_v34  ;;  %v592_v12 = vsel %vm50_vm0, %v542_v33, 0.0  ;;  %v589_v25 = vsel %vm50_vm0, %v541_v17, 0.0 }
 0x18f   :  { %v407_v18 = vpop.xlane.xlu1 %406  ;;  %v404_v35 = vpop.xlane.xlu0 %403  ;;  %593 = vadd.xlane.f32.xlu1 %v592_v12  ;;  %632 = vadd.xlane.f32.xlu0 %v631_v11 }
 0x190   :  { %v480_v20 = vmul.f32 0.125, %v407_v18  ;;  %v479_v47 = vmul.f32 0.125, %v404_v35  ;;  %v558_v22 = vmul.f32 %v1475_v59, %v1475_v59  ;;  %v557_v60 = vmul.f32 %v1478_v61, %v1478_v61 }
 0x192   :  { %v1488_v62 = vsub.f32 %v1306_v1, %v480_v20  ;;  %v1491_v23 = vsub.f32 %v1310_v3, %v479_v47  ;;  %v640_v24 = vsel %vm50_vm0, %v558_v22, 0.0  ;;  %v637_v31 = vsel %vm50_vm0, %v557_v60, 0.0 }
 0x193   :  { %v455_v26 = vpop.xlane.xlu1 %454  ;;  %v452_v27 = vpop.xlane.xlu0 %451  ;;  %641 = vadd.xlane.f32.xlu1 %v640_v24  ;;  %590 = vadd.xlane.f32.xlu0 %v589_v25 }
 0x194   :  { %v496_v28 = vmul.f32 0.125, %v455_v26  ;;  %v495_v29 = vmul.f32 0.125, %v452_v27  ;;  %v544_v30 = vmul.f32 %v1488_v62, %v1488_v62  ;;  %v543_v37 = vmul.f32 %v1491_v23, %v1491_v23 }
 0x196   :  { %v1499_v1 = vsub.f32 %v1308_v2, %v496_v28  ;;  %v1502_v3 = vsub.f32 %v1312_v4, %v495_v29  ;;  %v598_v32 = vsel %vm50_vm0, %v544_v30, 0.0  ;;  %v595_v63 = vsel %vm50_vm0, %v543_v37, 0.0 }
 0x197   :  { %v413_v38 = vpop.xlane.xlu1 %412  ;;  %v410_v44 = vpop.xlane.xlu0 %409  ;;  %599 = vadd.xlane.f32.xlu1 %v598_v32  ;;  %638 = vadd.xlane.f32.xlu0 %v637_v31 }
 0x198   :  { %v482_v43 = vmul.f32 0.125, %v413_v38  ;;  %v481_v52 = vmul.f32 0.125, %v410_v44  ;;  %v560_v54 = vmul.f32 %v1499_v1, %v1499_v1  ;;  %v559_v2 = vmul.f32 %v1502_v3, %v1502_v3 }
 0x19a   :  { %v1512_v4 = vsub.f32 %v1318_v7, %v482_v43  ;;  %v1515_v57 = vsub.f32 %v1322_v9, %v481_v52  ;;  %v646_v58 = vsel %vm50_vm0, %v560_v54, 0.0  ;;  %v643_v17 = vsel %vm50_vm0, %v559_v2, 0.0 }
 0x19b   :  { %v461_v6 = vpop.xlane.xlu1 %460  ;;  %v458_v34 = vpop.xlane.xlu0 %457  ;;  %647 = vadd.xlane.f32.xlu1 %v646_v58  ;;  %596 = vadd.xlane.f32.xlu0 %v595_v63 }
 0x19c   :  { %v498_v33 = vmul.f32 0.125, %v461_v6  ;;  %v497_v11 = vmul.f32 0.125, %v458_v34  ;;  %v546_v12 = vmul.f32 %v1512_v4, %v1512_v4  ;;  %v545_v35 = vmul.f32 %v1515_v57, %v1515_v57 }
 0x19e   :  { %v1523_v7 = vsub.f32 %v1320_v8, %v498_v33  ;;  %v1526_v9 = vsub.f32 %v1324_v10, %v497_v11  ;;  %v604_v18 = vsel %vm50_vm0, %v546_v12, 0.0  ;;  %v601_v27 = vsel %vm50_vm0, %v545_v35, 0.0 }
 0x19f   :  { %605 = vadd.xlane.f32.xlu1 %v604_v18  ;;  %v419_v20 = vpop.xlane.xlu1 %418  ;;  %644 = vadd.xlane.f32.xlu0 %v643_v17  ;;  %v416_v47 = vpop.xlane.xlu0 %415 }
 0x1a0   :  { %v484_v22 = vmul.f32 0.125, %v419_v20  ;;  %v483_v60 = vmul.f32 0.125, %v416_v47  ;;  %v562_v24 = vmul.f32 %v1523_v7, %v1523_v7  ;;  %v561_v8 = vmul.f32 %v1526_v9, %v1526_v9 }
 0x1a2   :  { %v1536_v10 = vsub.f32 %v1330_v13, %v484_v22  ;;  %v1539_v25 = vsub.f32 %v1334_v15, %v483_v60  ;;  %v652_v26 = vsel %vm50_vm0, %v562_v24, 0.0  ;;  %v649_v37 = vsel %vm50_vm0, %v561_v8, 0.0 }
 0x1a3   :  { %653 = vadd.xlane.f32.xlu1 %v652_v26  ;;  %v467_v28 = vpop.xlane.xlu1 %466  ;;  %602 = vadd.xlane.f32.xlu0 %v601_v27  ;;  %v464_v29 = vpop.xlane.xlu0 %463 }
 0x1a4   :  { %v500_v30 = vmul.f32 0.125, %v467_v28  ;;  %v499_v31 = vmul.f32 0.125, %v464_v29  ;;  %v548_v32 = vmul.f32 %v1536_v10, %v1536_v10  ;;  %v547_v44 = vmul.f32 %v1539_v25, %v1539_v25  ;;  %v1565_v29 = vld [vmem:[%s1798_s2] ss:$0 sm:$0xff] }
 0x1a6   :  { %v1547_v13 = vsub.f32 %v1332_v14, %v500_v30  ;;  %v1550_v15 = vsub.f32 %v1336_v16, %v499_v31  ;;  %v610_v38 = vsel %vm50_vm0, %v548_v32, 0.0  ;;  %v607_v54 = vsel %vm50_vm0, %v547_v44, 0.0  ;;  %v1571_v44 = vld [vmem:[%s1799_s3] ss:$0 sm:$0xff] }
 0x1a7   :  { %611 = vadd.xlane.f32.xlu1 %v610_v38  ;;  %650 = vadd.xlane.f32.xlu0 %v649_v37 }
 0x1a8   :  { %v564_v43 = vmul.f32 %v1547_v13, %v1547_v13  ;;  %v563_v14 = vmul.f32 %v1550_v15, %v1550_v15 }
 0x1aa   :  { %v658_v52 = vsel %vm50_vm0, %v564_v43, 0.0  ;;  %v655_v16 = vsel %vm50_vm0, %v563_v14, 0.0 }
 0x1ab   :  { %659 = vadd.xlane.f32.xlu1 %v658_v52  ;;  %608 = vadd.xlane.f32.xlu0 %v607_v54 }
 0x1af   :  { %656 = vadd.xlane.f32.xlu0 %v655_v16 }
 0x1fc   :  { %v570_v2 = vpop.xlane.xlu1 %569 }
 0x1fd   :  { %v662_v58 = vmul.f32 0.125, %v570_v2 }
 0x1ff   :  { %v694_v63 = vadd.f32 1e-05, %v662_v58 }
 0x200   :  { %v618_v6 = vpop.xlane.xlu1 %617  ;;  %v567_v34 = vpop.xlane.xlu0 %566 }
 0x201   :  { %1022 = vrsqrt.f32 %v694_v63  ;;  %v678_v33 = vmul.f32 0.125, %v618_v6  ;;  %v661_v11 = vmul.f32 0.125, %v567_v34 }
 0x203   :  { %v710_v12 = vadd.f32 1e-05, %v678_v33  ;;  %v693_v17 = vadd.f32 1e-05, %v661_v11 }
 0x204   :  { %v576_v18 = vpop.xlane.xlu1 %575  ;;  %v615_v35 = vpop.xlane.xlu0 %614 }
 0x205   :  { %1024 = vrsqrt.f32 %v710_v12  ;;  %v664_v20 = vmul.f32 0.125, %v576_v18  ;;  %v677_v47 = vmul.f32 0.125, %v615_v35 }
 0x206   :  { %1026 = vrsqrt.f32 %v693_v17 }
 0x207   :  { %v696_v22 = vadd.f32 1e-05, %v664_v20  ;;  %v709_v60 = vadd.f32 1e-05, %v677_v47 }
 0x208   :  { %v624_v24 = vpop.xlane.xlu1 %623  ;;  %v573_v8 = vpop.xlane.xlu0 %572 }
 0x209   :  { %1028 = vrsqrt.f32 %v696_v22  ;;  %v680_v26 = vmul.f32 0.125, %v624_v24  ;;  %v663_v27 = vmul.f32 0.125, %v573_v8 }
 0x20a   :  { %1030 = vrsqrt.f32 %v709_v60 }
 0x20b   :  { %v1023_v28 = vpop.eup %1022  ;;  %v712_v30 = vadd.f32 1e-05, %v680_v26  ;;  %v695_v31 = vadd.f32 1e-05, %v663_v27 }
 0x20c   :  { %v758_v32 = vmul.f32 %v1023_v28, %v1374_v48  ;;  %v582_v37 = vpop.xlane.xlu1 %581  ;;  %v621_v38 = vpop.xlane.xlu0 %620 }
 0x20d   :  { %1032 = vrsqrt.f32 %v712_v30  ;;  %v666_v43 = vmul.f32 0.125, %v582_v37  ;;  %v679_v52 = vmul.f32 0.125, %v621_v38 }
 0x20e   :  { %v797_v54 = vmul.f32 %v1565_v29, %v758_v32  ;;  %1034 = vrsqrt.f32 %v695_v31 }
 0x20f   :  { %v1025_v14 = vpop.eup %1024  ;;  %v698_v16 = vadd.f32 1e-05, %v666_v43  ;;  %v711_v2 = vadd.f32 1e-05, %v679_v52 }
 0x210   :  { %v1027_v58 = vpop.eup %1026  ;;  %v836_v63 = vadd.f32 %v1571_v44, %v797_v54  ;;  %v774_v48 = vmul.f32 %v1025_v14, %v1371_v45  ;;  %v630_v6 = vpop.xlane.xlu1 %629 }
 0x211   :  { %v579_v34 = vpop.xlane.xlu0 %578  ;;  %v757_v33 = vmul.f32 %v1027_v58, %v1379_v0  ;;  %1036 = vrsqrt.f32 %v698_v16  ;;  %v682_v11 = vmul.f32 0.125, %v630_v6 }
 0x212   :  { %v665_v12 = vmul.f32 0.125, %v579_v34  ;;  %868 = vst.msk [vmem:[%s1800_s4 + $0x8] sm:$0xff] %vm50_vm0, %v836_v63  ;;  %v813_v17 = vmul.f32 %v1565_v29, %v774_v48  ;;  %1038 = vrsqrt.f32 %v711_v2 }
 0x213   :  { %v1029_v18 = vpop.eup %1028  ;;  %v796_v35 = vmul.f32 %v1565_v29, %v757_v33  ;;  %v714_v20 = vadd.f32 1e-05, %v682_v11 }
 0x214   :  { %v697_v45 = vadd.f32 1e-05, %v665_v12  ;;  %v1031_v47 = vpop.eup %1030  ;;  %v852_v22 = vadd.f32 %v1571_v44, %v813_v17  ;;  %v760_v0 = vmul.f32 %v1029_v18, %v1382_v5  ;;  %v588_v60 = vpop.xlane.xlu1 %587 }
 0x215   :  { %v627_v24 = vpop.xlane.xlu0 %626  ;;  %v835_v8 = vadd.f32 %v1571_v44, %v796_v35  ;;  %v773_v26 = vmul.f32 %v1031_v47, %v1392_v19  ;;  %1040 = vrsqrt.f32 %v714_v20  ;;  %v668_v27 = vmul.f32 0.125, %v588_v60 }
 0x216   :  { %884 = vst.msk [vmem:[%s1800_s4 + $0x88] sm:$0xff] %vm50_vm0, %v852_v22  ;;  %v799_v28 = vmul.f32 %v1565_v29, %v760_v0  ;;  %1042 = vrsqrt.f32 %v697_v45  ;;  %v681_v30 = vmul.f32 0.125, %v627_v24 }
 0x217   :  { %v1033_v31 = vpop.eup %1032  ;;  %867 = vst.msk [vmem:[%s1800_s4] sm:$0xff] %vm50_vm0, %v835_v8  ;;  %v812_v5 = vmul.f32 %v1565_v29, %v773_v26  ;;  %v700_v19 = vadd.f32 1e-05, %v668_v27 }
 0x218   :  { %v1035_v32 = vpop.eup %1034  ;;  %v838_v37 = vadd.f32 %v1571_v44, %v799_v28  ;;  %v776_v38 = vmul.f32 %v1033_v31, %v1395_v39  ;;  %v713_v43 = vadd.f32 1e-05, %v681_v30  ;;  %v636_v52 = vpop.xlane.xlu1 %635 }
 0x219   :  { %v585_v54 = vpop.xlane.xlu0 %584  ;;  %v851_v14 = vadd.f32 %v1571_v44, %v812_v5  ;;  %v759_v16 = vmul.f32 %v1035_v32, %v1406_v40  ;;  %1044 = vrsqrt.f32 %v700_v19  ;;  %v684_v2 = vmul.f32 0.125, %v636_v52 }
 0x21a   :  { %870 = vst.msk [vmem:[%s1800_s4 + $0x18] sm:$0xff] %vm50_vm0, %v838_v37  ;;  %v815_v58 = vmul.f32 %v1565_v29, %v776_v38  ;;  %1046 = vrsqrt.f32 %v713_v43  ;;  %v667_v63 = vmul.f32 0.125, %v585_v54 }
 0x21b   :  { %v1037_v48 = vpop.eup %1036  ;;  %883 = vst.msk [vmem:[%s1800_s4 + $0x80] sm:$0xff] %vm50_vm0, %v851_v14  ;;  %v798_v39 = vmul.f32 %v1565_v29, %v759_v16  ;;  %v716_v40 = vadd.f32 1e-05, %v684_v2 }
 0x21c   :  { %v1039_v6 = vpop.eup %1038  ;;  %v854_v34 = vadd.f32 %v1571_v44, %v815_v58  ;;  %v762_v33 = vmul.f32 %v1037_v48, %v1416_v41  ;;  %v699_v11 = vadd.f32 1e-05, %v667_v63  ;;  %v594_v12 = vpop.xlane.xlu1 %593 }
 0x21d   :  { %v633_v17 = vpop.xlane.xlu0 %632  ;;  %v837_v18 = vadd.f32 %v1571_v44, %v798_v39  ;;  %v775_v35 = vmul.f32 %v1039_v6, %v1403_v36  ;;  %1048 = vrsqrt.f32 %v716_v40  ;;  %v670_v20 = vmul.f32 0.125, %v594_v12 }
 0x21e   :  { %886 = vst.msk [vmem:[%s1800_s4 + $0x98] sm:$0xff] %vm50_vm0, %v854_v34  ;;  %v801_v45 = vmul.f32 %v1565_v29, %v762_v33  ;;  %1050 = vrsqrt.f32 %v699_v11  ;;  %v683_v47 = vmul.f32 0.125, %v633_v17 }
 0x21f   :  { %v1041_v22 = vpop.eup %1040  ;;  %869 = vst.msk [vmem:[%s1800_s4 + $0x10] sm:$0xff] %vm50_vm0, %v837_v18  ;;  %v814_v41 = vmul.f32 %v1565_v29, %v775_v35  ;;  %v702_v36 = vadd.f32 1e-05, %v670_v20 }
 0x220   :  { %v1043_v0 = vpop.eup %1042  ;;  %v840_v60 = vadd.f32 %v1571_v44, %v801_v45  ;;  %v778_v24 = vmul.f32 %v1041_v22, %v1427_v46  ;;  %v715_v8 = vadd.f32 1e-05, %v683_v47  ;;  %v642_v26 = vpop.xlane.xlu1 %641 }
 0x221   :  { %v591_v27 = vpop.xlane.xlu0 %590  ;;  %v853_v28 = vadd.f32 %v1571_v44, %v814_v41  ;;  %v761_v30 = vmul.f32 %v1043_v0, %v1419_v42  ;;  %1052 = vrsqrt.f32 %v702_v36  ;;  %v686_v31 = vmul.f32 0.125, %v642_v26 }
 0x222   :  { %872 = vst.msk [vmem:[%s1800_s4 + $0x28] sm:$0xff] %vm50_vm0, %v840_v60  ;;  %v817_v5 = vmul.f32 %v1565_v29, %v778_v24  ;;  %1054 = vrsqrt.f32 %v715_v8  ;;  %v669_v19 = vmul.f32 0.125, %v591_v27 }
 0x223   :  { %v1045_v32 = vpop.eup %1044  ;;  %885 = vst.msk [vmem:[%s1800_s4 + $0x90] sm:$0xff] %vm50_vm0, %v853_v28  ;;  %v800_v46 = vmul.f32 %v1565_v29, %v761_v30  ;;  %v718_v42 = vadd.f32 1e-05, %v686_v31 }
 0x224   :  { %v1047_v37 = vpop.eup %1046  ;;  %v856_v38 = vadd.f32 %v1571_v44, %v817_v5  ;;  %v764_v43 = vmul.f32 %v1045_v32, %v1440_v50  ;;  %v701_v52 = vadd.f32 1e-05, %v669_v19  ;;  %v600_v54 = vpop.xlane.xlu1 %599 }
 0x225   :  { %v639_v14 = vpop.xlane.xlu0 %638  ;;  %v839_v16 = vadd.f32 %v1571_v44, %v800_v46  ;;  %v777_v2 = vmul.f32 %v1047_v37, %v1430_v49  ;;  %1056 = vrsqrt.f32 %v718_v42  ;;  %v672_v58 = vmul.f32 0.125, %v600_v54 }
 0x226   :  { %888 = vst.msk [vmem:[%s1800_s4 + $0xa8] sm:$0xff] %vm50_vm0, %v856_v38  ;;  %v803_v63 = vmul.f32 %v1565_v29, %v764_v43  ;;  %1058 = vrsqrt.f32 %v701_v52  ;;  %v685_v48 = vmul.f32 0.125, %v639_v14 }
 0x227   :  { %v1049_v39 = vpop.eup %1048  ;;  %871 = vst.msk [vmem:[%s1800_s4 + $0x20] sm:$0xff] %vm50_vm0, %v839_v16  ;;  %v816_v50 = vmul.f32 %v1565_v29, %v777_v2  ;;  %v704_v49 = vadd.f32 1e-05, %v672_v58 }
 0x228   :  { %v1051_v40 = vpop.eup %1050  ;;  %v842_v6 = vadd.f32 %v1571_v44, %v803_v63  ;;  %v780_v34 = vmul.f32 %v1049_v39, %v1451_v51  ;;  %v717_v33 = vadd.f32 1e-05, %v685_v48  ;;  %v648_v11 = vpop.xlane.xlu1 %647 }
 0x229   :  { %v597_v12 = vpop.xlane.xlu0 %596  ;;  %v855_v17 = vadd.f32 %v1571_v44, %v816_v50  ;;  %v763_v18 = vmul.f32 %v1051_v40, %v1443_v21  ;;  %1060 = vrsqrt.f32 %v704_v49  ;;  %v688_v35 = vmul.f32 0.125, %v648_v11 }
 0x22a   :  { %874 = vst.msk [vmem:[%s1800_s4 + $0x38] sm:$0xff] %vm50_vm0, %v842_v6  ;;  %v819_v20 = vmul.f32 %v1565_v29, %v780_v34  ;;  %1062 = vrsqrt.f32 %v717_v33  ;;  %v671_v45 = vmul.f32 0.125, %v597_v12 }
 0x22b   :  { %v1053_v47 = vpop.eup %1052  ;;  %887 = vst.msk [vmem:[%s1800_s4 + $0xa0] sm:$0xff] %vm50_vm0, %v855_v17  ;;  %v802_v51 = vmul.f32 %v1565_v29, %v763_v18  ;;  %v720_v21 = vadd.f32 1e-05, %v688_v35 }
 0x22c   :  { %v1055_v22 = vpop.eup %1054  ;;  %v858_v41 = vadd.f32 %v1571_v44, %v819_v20  ;;  %v766_v36 = vmul.f32 %v1053_v47, %v1464_v56  ;;  %v703_v0 = vadd.f32 1e-05, %v671_v45  ;;  %v606_v60 = vpop.xlane.xlu1 %605 }
 0x22d   :  { %v645_v24 = vpop.xlane.xlu0 %644  ;;  %v841_v8 = vadd.f32 %v1571_v44, %v802_v51  ;;  %v779_v26 = vmul.f32 %v1055_v22, %v1454_v55  ;;  %1064 = vrsqrt.f32 %v720_v21  ;;  %v674_v27 = vmul.f32 0.125, %v606_v60 }
 0x22e   :  { %890 = vst.msk [vmem:[%s1800_s4 + $0xb8] sm:$0xff] %vm50_vm0, %v858_v41  ;;  %v805_v28 = vmul.f32 %v1565_v29, %v766_v36  ;;  %1066 = vrsqrt.f32 %v703_v0  ;;  %v687_v30 = vmul.f32 0.125, %v645_v24 }
 0x22f   :  { %v1057_v31 = vpop.eup %1056  ;;  %873 = vst.msk [vmem:[%s1800_s4 + $0x30] sm:$0xff] %vm50_vm0, %v841_v8  ;;  %v818_v56 = vmul.f32 %v1565_v29, %v779_v26  ;;  %v706_v55 = vadd.f32 1e-05, %v674_v27 }
 0x230   :  { %v1059_v5 = vpop.eup %1058  ;;  %v844_v19 = vadd.f32 %v1571_v44, %v805_v28  ;;  %v782_v32 = vmul.f32 %v1057_v31, %v1475_v59  ;;  %v719_v46 = vadd.f32 1e-05, %v687_v30  ;;  %v654_v42 = vpop.xlane.xlu1 %653 }
 0x231   :  { %v603_v37 = vpop.xlane.xlu0 %602  ;;  %v857_v38 = vadd.f32 %v1571_v44, %v818_v56  ;;  %v765_v43 = vmul.f32 %v1059_v5, %v1467_v53  ;;  %1068 = vrsqrt.f32 %v706_v55  ;;  %v690_v52 = vmul.f32 0.125, %v654_v42 }
 0x232   :  { %876 = vst.msk [vmem:[%s1800_s4 + $0x48] sm:$0xff] %vm50_vm0, %v844_v19  ;;  %v821_v54 = vmul.f32 %v1565_v29, %v782_v32  ;;  %1070 = vrsqrt.f32 %v719_v46  ;;  %v673_v14 = vmul.f32 0.125, %v603_v37 }
 0x233   :  { %v1061_v16 = vpop.eup %1060  ;;  %889 = vst.msk [vmem:[%s1800_s4 + $0xb0] sm:$0xff] %vm50_vm0, %v857_v38  ;;  %v804_v59 = vmul.f32 %v1565_v29, %v765_v43  ;;  %v722_v53 = vadd.f32 1e-05, %v690_v52 }
 0x234   :  { %v1063_v2 = vpop.eup %1062  ;;  %v860_v58 = vadd.f32 %v1571_v44, %v821_v54  ;;  %v768_v63 = vmul.f32 %v1061_v16, %v1488_v62  ;;  %v705_v48 = vadd.f32 1e-05, %v673_v14  ;;  %v612_v39 = vpop.xlane.xlu1 %611 }
 0x235   :  { %v651_v50 = vpop.xlane.xlu0 %650  ;;  %v843_v49 = vadd.f32 %v1571_v44, %v804_v59  ;;  %v781_v40 = vmul.f32 %v1063_v2, %v1478_v61  ;;  %1072 = vrsqrt.f32 %v722_v53  ;;  %v676_v6 = vmul.f32 0.125, %v612_v39 }
 0x236   :  { %892 = vst.msk [vmem:[%s1800_s4 + $0xc8] sm:$0xff] %vm50_vm0, %v860_v58  ;;  %v807_v34 = vmul.f32 %v1565_v29, %v768_v63  ;;  %1074 = vrsqrt.f32 %v705_v48  ;;  %v689_v33 = vmul.f32 0.125, %v651_v50 }
 0x237   :  { %v1065_v11 = vpop.eup %1064  ;;  %875 = vst.msk [vmem:[%s1800_s4 + $0x40] sm:$0xff] %vm50_vm0, %v843_v49  ;;  %v820_v62 = vmul.f32 %v1565_v29, %v781_v40  ;;  %v708_v61 = vadd.f32 1e-05, %v676_v6 }
 0x238   :  { %v1067_v12 = vpop.eup %1066  ;;  %v846_v17 = vadd.f32 %v1571_v44, %v807_v34  ;;  %v784_v18 = vmul.f32 %v1065_v11, %v1499_v1  ;;  %v721_v35 = vadd.f32 1e-05, %v689_v33  ;;  %v660_v20 = vpop.xlane.xlu1 %659 }
 0x239   :  { %v609_v45 = vpop.xlane.xlu0 %608  ;;  %v859_v47 = vadd.f32 %v1571_v44, %v820_v62  ;;  %v767_v51 = vmul.f32 %v1067_v12, %v1491_v23  ;;  %1076 = vrsqrt.f32 %v708_v61  ;;  %v692_v21 = vmul.f32 0.125, %v660_v20 }
 0x23a   :  { %878 = vst.msk [vmem:[%s1800_s4 + $0x58] sm:$0xff] %vm50_vm0, %v846_v17  ;;  %v823_v22 = vmul.f32 %v1565_v29, %v784_v18  ;;  %1078 = vrsqrt.f32 %v721_v35  ;;  %v675_v41 = vmul.f32 0.125, %v609_v45 }
 0x23b   :  { %v1069_v36 = vpop.eup %1068  ;;  %891 = vst.msk [vmem:[%s1800_s4 + $0xc0] sm:$0xff] %vm50_vm0, %v859_v47  ;;  %v806_v1 = vmul.f32 %v1565_v29, %v767_v51  ;;  %v724_v23 = vadd.f32 1e-05, %v692_v21 }
 0x23c   :  { %v1071_v0 = vpop.eup %1070  ;;  %v862_v60 = vadd.f32 %v1571_v44, %v823_v22  ;;  %v770_v24 = vmul.f32 %v1069_v36, %v1512_v4  ;;  %v707_v8 = vadd.f32 1e-05, %v675_v41 }
 0x23d   :  { %v657_v26 = vpop.xlane.xlu0 %656  ;;  %v845_v27 = vadd.f32 %v1571_v44, %v806_v1  ;;  %v783_v28 = vmul.f32 %v1071_v0, %v1502_v3  ;;  %1080 = vrsqrt.f32 %v724_v23 }
 0x23e   :  { %v691_v30 = vmul.f32 0.125, %v657_v26  ;;  %894 = vst.msk [vmem:[%s1800_s4 + $0xd8] sm:$0xff] %vm50_vm0, %v862_v60  ;;  %v809_v31 = vmul.f32 %v1565_v29, %v770_v24  ;;  %1082 = vrsqrt.f32 %v707_v8 }
 0x23f   :  { %v1073_v56 = vpop.eup %1072  ;;  %877 = vst.msk [vmem:[%s1800_s4 + $0x50] sm:$0xff] %vm50_vm0, %v845_v27  ;;  %v822_v4 = vmul.f32 %v1565_v29, %v783_v28 }
 0x240   :  { %v723_v55 = vadd.f32 1e-05, %v691_v30  ;;  %v1075_v3 = vpop.eup %1074  ;;  %v848_v5 = vadd.f32 %v1571_v44, %v809_v31  ;;  %v786_v19 = vmul.f32 %v1073_v56, %v1523_v7 }
 0x241   :  { %v861_v32 = vadd.f32 %v1571_v44, %v822_v4  ;;  %v769_v46 = vmul.f32 %v1075_v3, %v1515_v57 }
 0x242   :  { %1084 = vrsqrt.f32 %v723_v55  ;;  %880 = vst.msk [vmem:[%s1800_s4 + $0x68] sm:$0xff] %vm50_vm0, %v848_v5  ;;  %v825_v42 = vmul.f32 %v1565_v29, %v786_v19 }
 0x243   :  { %v1077_v37 = vpop.eup %1076  ;;  %893 = vst.msk [vmem:[%s1800_s4 + $0xd0] sm:$0xff] %vm50_vm0, %v861_v32  ;;  %v808_v7 = vmul.f32 %v1565_v29, %v769_v46 }
 0x244   :  { %v1079_v38 = vpop.eup %1078  ;;  %v864_v43 = vadd.f32 %v1571_v44, %v825_v42  ;;  %v772_v57 = vmul.f32 %v1077_v37, %v1536_v10 }
 0x245   :  { %v847_v52 = vadd.f32 %v1571_v44, %v808_v7  ;;  %v785_v54 = vmul.f32 %v1079_v38, %v1526_v9 }
 0x246   :  { %896 = vst.msk [vmem:[%s1800_s4 + $0xe8] sm:$0xff] %vm50_vm0, %v864_v43  ;;  %v811_v14 = vmul.f32 %v1565_v29, %v772_v57 }
 0x247   :  { %v1081_v16 = vpop.eup %1080  ;;  %879 = vst.msk [vmem:[%s1800_s4 + $0x60] sm:$0xff] %vm50_vm0, %v847_v52  ;;  %v824_v59 = vmul.f32 %v1565_v29, %v785_v54 }
 0x248   :  { %v1083_v10 = vpop.eup %1082  ;;  %v850_v53 = vadd.f32 %v1571_v44, %v811_v14  ;;  %v788_v9 = vmul.f32 %v1081_v16, %v1547_v13 }
 0x249   :  { %v863_v2 = vadd.f32 %v1571_v44, %v824_v59  ;;  %v771_v58 = vmul.f32 %v1083_v10, %v1539_v25 }
 0x24a   :  { %882 = vst.msk [vmem:[%s1800_s4 + $0x78] sm:$0xff] %vm50_vm0, %v850_v53  ;;  %v827_v63 = vmul.f32 %v1565_v29, %v788_v9 }
 0x24b   :  { %895 = vst.msk [vmem:[%s1800_s4 + $0xe0] sm:$0xff] %vm50_vm0, %v863_v2  ;;  %v810_v39 = vmul.f32 %v1565_v29, %v771_v58 }
 0x24c   :  { %v1085_v48 = vpop.eup %1084  ;;  %v866_v13 = vadd.f32 %v1571_v44, %v827_v63 }
 0x24d   :  { %v787_v50 = vmul.f32 %v1085_v48, %v1550_v15  ;;  %v849_v25 = vadd.f32 %v1571_v44, %v810_v39 }
 0x24e   :  { %898 = vst.msk [vmem:[%s1800_s4 + $0xf8] sm:$0xff] %vm50_vm0, %v866_v13 }
 0x24f   :  { %v826_v49 = vmul.f32 %v1565_v29, %v787_v50  ;;  %881 = vst.msk [vmem:[%s1800_s4 + $0x70] sm:$0xff] %vm50_vm0, %v849_v25 }
 0x251   :  { %v865_v40 = vadd.f32 %v1571_v44, %v826_v49 }
 0x253   :  { %897 = vst.msk [vmem:[%s1800_s4 + $0xf0] sm:$0xff] %vm50_vm0, %v865_v40 }

</bundles_post_ra>
